<compile_context>
chip_gen: v5e
topology: v5e:2x2
jax: 0.10.0
libtpu: 0.0.40
codegen_flags: <defaults>
</compile_context>

<pallas_src>
import functools

import jax
import jax.numpy as jnp
from jax.experimental import pallas as pl
from jax.experimental.pallas import tpu as pltpu

_LANE = 128
_SUBLANE = 8
_VMEM_BUDGET = 36 * 1024 * 1024      # per-step working-set target (v7x: 64 MiB/TC)
_VMEM_LIMIT_CAP = 56 * 1024 * 1024   # never ask Mosaic for more than this


def _round_up(x, m):
    return ((x + m - 1) // m) * m


def _cdiv(a, b):
    return (a + b - 1) // b


def _vmem_step_bytes(tb, ne, in_dim, na, embed_dim, out_dim, in_itemsize):
    """Rough per-grid-step VMEM working set (double-buffered IO + f32 temps)."""
    wide_in = na * embed_dim
    wide_out = na * out_dim
    rows = tb * ne
    lane = lambda n: _round_up(max(n, 1), _LANE)
    io = 2 * (rows * lane(in_dim) * in_itemsize        # entities
              + rows * lane(na) * in_itemsize          # pre keep-mask
              + tb * lane(na) * in_itemsize            # post keep-mask
              + tb * lane(wide_out) * 4)               # f32 output tile
    temps = (3 * rows * lane(wide_in) * 4              # et / keep / masked slabs
             + tb * lane(wide_in) * 4                  # pooled slab
             + 2 * tb * lane(wide_out) * 4)            # out / post_wide
    weights = 2 * (_round_up(in_dim, _SUBLANE) * lane(wide_in) * in_itemsize
                   + _round_up(na, _SUBLANE) * lane(wide_in) * in_itemsize
                   + _round_up(wide_in, _SUBLANE) * lane(wide_out) * 4
                   + _round_up(na, _SUBLANE) * lane(wide_out) * in_itemsize
                   + _SUBLANE * lane(wide_in) * 4
                   + _SUBLANE * lane(wide_out) * 4)
    return io + temps + weights + (2 << 20)


def _entity_pooling_kernel(ents_ref, keep_ref, post_ref,
                           w_in_ref, b_in_ref, s_in_ref,
                           w_out_ref, b_out_ref, s_out_ref,
                           out_ref, *, pooling_type, ne):
    """One batch tile of `tb` elements per grid step; all ops are lane-dense 2-D."""
    rows = ents_ref.shape[0]                      # tb * ne
    tb = rows // ne
    wide_in = w_in_ref.shape[1]                   # n_agents * embed_dim

    # (1) input projection, replicated across agent lane-groups.
    #     ONE MXU matmul, M = tb*ne rows; bias added before masking (reference
    #     masks ents_trans which already contains the bias).
    et = jnp.dot(ents_ref[...], w_in_ref[...],
                 preferred_element_type=jnp.float32) + b_in_ref[...]

    # (2) lane-dense (entity, agent) keep-mask via a tiny-K MXU matmul (0/1 exact);
    #     one element-wise multiply implements masked_fill(pre_mask, 0).
    keep = jnp.dot(keep_ref[...], s_in_ref[...],
                   preferred_element_type=jnp.float32)
    masked = et * keep                            # (tb*ne, na*embed)
    masked = masked.reshape(tb, ne, wide_in)      # ne -> sublane axis

    # (3) pool over entities; (n_agents, embed) stays folded in lanes.
    if pooling_type == "max":
        pool = jnp.max(masked, axis=1)            # (tb, na*embed)
    elif pooling_type == "mean":
        pool = jnp.sum(masked, axis=1) * (1.0 / ne)   # torch .mean(dim=2): /ne always
    else:
        raise ValueError(f"unsupported pooling_type {pooling_type!r}")

    # (4) output projection: block-diagonal W_out keeps the agent dim in lanes,
    #     so this is ONE matmul with M = tb and the store is a full-lane slab.
    out = jnp.dot(pool, w_out_ref[...],
                  preferred_element_type=jnp.float32) + b_out_ref[...]
    post = jnp.dot(post_ref[...], s_out_ref[...],
                   preferred_element_type=jnp.float32)
    out_ref[...] = (out * post).astype(out_ref.dtype)


def entity_pooling_layer(entities, pre_mask, post_mask,
                         w_in, b_in, w_out, b_out,
                         *, n_agents, pooling_type="max", max_tb=2048,
                         compute_dtype=jnp.bfloat16):
    """Pallas implementation of EntityPoolingLayer.forward.

    entities : (bs, ne, in_dim) float
    pre_mask : (bs, >=n_agents, ne) bool  (True = mask out before pooling)
    post_mask: (bs, n_agents) bool        (True = zero out agent's output)
    returns  : (bs, n_agents, out_dim) float32
    """
    if pooling_type not in ("max", "mean"):
        raise ValueError(f"unsupported pooling_type {pooling_type!r}")

    bs, ne, in_dim = entities.shape
    embed_dim = w_in.shape[1]
    out_dim = w_out.shape[1]
    na = n_agents
    wide_in = na * embed_dim
    wide_out = na * out_dim

    n_queries = post_mask.shape[1]
    assert n_queries == n_agents, "kernel assumes n_queries == n_agents"
    # The reference reshape requires in_dim == embed_dim; keep that contract.
    assert in_dim == embed_dim, "reference semantics require in_dim == embed_dim"

    in_itemsize = jnp.dtype(compute_dtype).itemsize

    # ---- batch-tile selection --------------------------------------------------
    tb = max(_SUBLANE, min((int(max_tb) // _SUBLANE) * _SUBLANE,
                           _round_up(bs, _SUBLANE)))
    # Prefer >= 2 grid steps so megacore / multi-TensorCore chips shard the batch.
    if bs > _SUBLANE and _cdiv(bs, tb) < 2:
        tb = max(_SUBLANE, _round_up(_cdiv(bs, 2), _SUBLANE))
    # Shrink until the per-step working set fits the VMEM budget.
    while tb > _SUBLANE and _vmem_step_bytes(
            tb, ne, in_dim, na, embed_dim, out_dim, in_itemsize) > _VMEM_BUDGET:
        tb = max(_SUBLANE, ((tb // 2) // _SUBLANE) * _SUBLANE)
    bs_pad = _round_up(bs, tb)

    est = _vmem_step_bytes(tb, ne, in_dim, na, embed_dim, out_dim, in_itemsize)
    vmem_limit = int(min(_VMEM_LIMIT_CAP, max(32 << 20, est + (8 << 20))))

    # ---- operand preparation (cheap; masks are tiny, reshapes are free) --------
    ents = entities.astype(compute_dtype)                               # (bs, ne, in)
    pre_keep = jnp.logical_not(pre_mask[:, :n_queries].astype(bool))
    pre_keep = jnp.transpose(pre_keep, (0, 2, 1)).astype(compute_dtype)  # (bs, ne, na)
    post_keep = jnp.logical_not(post_mask.astype(bool)).astype(compute_dtype)  # (bs, na)

    if bs_pad != bs:
        pad = bs_pad - bs
        ents = jnp.pad(ents, ((0, pad), (0, 0), (0, 0)))
        pre_keep = jnp.pad(pre_keep, ((0, pad), (0, 0), (0, 0)))
        post_keep = jnp.pad(post_keep, ((0, pad), (0, 0)))

    ents2d = ents.reshape(bs_pad * ne, in_dim)         # rows ordered (batch, entity)
    pre2d = pre_keep.reshape(bs_pad * ne, na)

    # ---- lane-dense weight packing (tiny; fuses under jit) ---------------------
    w_in_rep = jnp.tile(w_in.astype(compute_dtype), (1, na))            # (in, na*embed)
    b_in_rep = jnp.tile(b_in.reshape(1, embed_dim), (1, na)).astype(jnp.float32)
    s_in = jnp.repeat(jnp.eye(na, dtype=compute_dtype), embed_dim, axis=1)   # (na, na*embed)
    w_out_blk = jnp.kron(jnp.eye(na, dtype=jnp.float32),
                         w_out.astype(jnp.float32))                     # (na*embed, na*out)
    b_out_rep = jnp.tile(b_out.reshape(1, out_dim), (1, na)).astype(jnp.float32)
    s_out = jnp.repeat(jnp.eye(na, dtype=compute_dtype), out_dim, axis=1)    # (na, na*out)

    kernel = functools.partial(_entity_pooling_kernel,
                               pooling_type=pooling_type, ne=ne)

    grid_spec = pltpu.PrefetchScalarGridSpec(
        num_scalar_prefetch=0,
        grid=(bs_pad // tb,),
        in_specs=[
            pl.BlockSpec((tb * ne, in_dim), lambda i: (i, 0)),      # entities
            pl.BlockSpec((tb * ne, na), lambda i: (i, 0)),          # pre keep-mask
            pl.BlockSpec((tb, na), lambda i: (i, 0)),               # post keep-mask
            pl.BlockSpec((in_dim, wide_in), lambda i: (0, 0)),      # W_in replicated
            pl.BlockSpec((1, wide_in), lambda i: (0, 0)),           # b_in replicated
            pl.BlockSpec((na, wide_in), lambda i: (0, 0)),          # pre-mask expander
            pl.BlockSpec((wide_in, wide_out), lambda i: (0, 0)),    # block-diag W_out
            pl.BlockSpec((1, wide_out), lambda i: (0, 0)),          # b_out replicated
            pl.BlockSpec((na, wide_out), lambda i: (0, 0)),         # post-mask expander
        ],
        # Lane-dense output slab: n_agents*out_dim lanes per batch row.
        out_specs=pl.BlockSpec((tb, wide_out), lambda i: (i, 0)),
    )

    out_flat = pl.pallas_call(
        kernel,
        out_shape=jax.ShapeDtypeStruct((bs_pad, wide_out), jnp.float32),
        grid_spec=grid_spec,
        compiler_params=pltpu.CompilerParams(
            dimension_semantics=("parallel",),
            vmem_limit_bytes=vmem_limit),
    )(ents2d, pre2d, post_keep,
      w_in_rep, b_in_rep, s_in, w_out_blk, b_out_rep, s_out)

    # Free reshape back to (bs, n_agents, out_dim), dropping batch padding.
    return out_flat[:bs].reshape(bs, na, out_dim)


def entity_pooling_reference(entities, pre_mask, post_mask,
                             w_in, b_in, w_out, b_out,
                             *, n_agents, pooling_type="max"):
    """Pure-JAX reference matching the PyTorch forward semantics."""
    bs, ne, _ = entities.shape
    ents_trans = entities @ w_in + b_in                                # (bs, ne, ed)
    n_queries = post_mask.shape[1]
    pm = pre_mask[:, :n_queries]                                       # (bs, na, ne)
    rep = jnp.broadcast_to(ents_trans[:, None],
                           (bs, n_agents, ne, ents_trans.shape[-1]))
    rep = jnp.where(pm[..., None], 0.0, rep)
    if pooling_type == "max":
        pool = jnp.max(rep, axis=2)
    else:
        pool = jnp.mean(rep, axis=2)
    out = pool @ w_out + b_out
    out = jnp.where(post_mask[..., None], 0.0, out)
    return out


if __name__ == "__main__":
    # Small shapes consistent with the module.
    bs, ne, n_agents = 2, 8, 4
    in_dim = embed_dim = 32   # reference code's reshape requires in_dim == embed_dim
    out_dim = 32

    key = jax.random.PRNGKey(0)
    (k_e, k_pm, k_qm, k_wi, k_bi, k_wo, k_bo,
     k_e2, k_pm2, k_qm2) = jax.random.split(key, 10)

    entities = jax.random.normal(k_e, (bs, ne, in_dim), dtype=jnp.float32)
    pre_mask = jax.random.bernoulli(k_pm, 0.3, (bs, n_agents, ne))     # True = masked
    post_mask = jax.random.bernoulli(k_qm, 0.25, (bs, n_agents))       # True = masked

    # Deterministic parameter init (PyTorch Linear-style uniform bounds).
    lim_in = float(in_dim) ** -0.5
    lim_out = float(embed_dim) ** -0.5
    w_in = jax.random.uniform(k_wi, (in_dim, embed_dim), jnp.float32, -lim_in, lim_in)
    b_in = jax.random.uniform(k_bi, (embed_dim,), jnp.float32, -lim_in, lim_in)
    w_out = jax.random.uniform(k_wo, (embed_dim, out_dim), jnp.float32, -lim_out, lim_out)
    b_out = jax.random.uniform(k_bo, (out_dim,), jnp.float32, -lim_out, lim_out)

    # Second config exercises the batch-tiled grid + padding path (grid = 2).
    bs2 = 19
    entities2 = jax.random.normal(k_e2, (bs2, ne, in_dim), dtype=jnp.float32)
    pre_mask2 = jax.random.bernoulli(k_pm2, 0.3, (bs2, n_agents, ne))
    post_mask2 = jax.random.bernoulli(k_qm2, 0.25, (bs2, n_agents))

    # Reference uses the same bf16-quantized entities / W_in as the kernel so the
    # only residual difference is f32 accumulation order.
    w_in_q = w_in.astype(jnp.bfloat16).astype(jnp.float32)

    ok = True
    cases = [
        (entities, pre_mask, post_mask, 2048),   # single grid step (tiny batch)
        (entities2, pre_mask2, post_mask2, 2048),  # split into >= 2 grid steps + padding
    ]
    for ents_c, pre_c, post_c, max_tb in cases:
        ents_q = ents_c.astype(jnp.bfloat16).astype(jnp.float32)
        for pooling_type in ("max", "mean"):
            out = entity_pooling_layer(ents_c, pre_c, post_c,
                                       w_in, b_in, w_out, b_out,
                                       n_agents=n_agents,
                                       pooling_type=pooling_type,
                                       max_tb=max_tb)
            out = jax.block_until_ready(out)
            ref = entity_pooling_reference(ents_q, pre_c, post_c,
                                           w_in_q, b_in, w_out, b_out,
                                           n_agents=n_agents,
                                           pooling_type=pooling_type)
            if not jnp.allclose(out, ref, atol=2e-3, rtol=2e-3):
                ok = False
                print(f"MISMATCH pooling_type={pooling_type} bs={ents_c.shape[0]} "
                      f"max_abs_err={float(jnp.max(jnp.abs(out - ref)))}")

    if ok:
        print("KERNEL_OK")
</pallas_src>

<mosaic_0001>
module attributes {stable_mosaic.version = 11 : i64} {
  func.func @_entity_pooling_kernel(%arg0: i32, %arg1: memref<64x32xbf16, #tpu.memory_space<vmem>>, %arg2: memref<64x4xbf16, #tpu.memory_space<vmem>>, %arg3: memref<8x4xbf16, #tpu.memory_space<vmem>>, %arg4: memref<32x128xbf16, #tpu.memory_space<vmem>>, %arg5: memref<1x128xf32, #tpu.memory_space<vmem>>, %arg6: memref<4x128xbf16, #tpu.memory_space<vmem>>, %arg7: memref<128x128xf32, #tpu.memory_space<vmem>>, %arg8: memref<1x128xf32, #tpu.memory_space<vmem>>, %arg9: memref<4x128xbf16, #tpu.memory_space<vmem>>, %arg10: memref<8x128xf32, #tpu.memory_space<vmem>>) attributes {dimension_semantics = [#tpu.dimension_semantics<parallel>], iteration_bounds = array<i64: 1>, scalar_prefetch = 0 : i64, scratch_operands = 0 : i64, tpu.core_type = #tpu.core_type<tc>, window_params = [{transform_indices = @transform_0, window_bounds = array<i64: 64, 32>}, {transform_indices = @transform_1, window_bounds = array<i64: 64, 4>}, {transform_indices = @transform_2, window_bounds = array<i64: 8, 4>}, {pipeline_mode = #tpu.pipeline_mode<synchronous>, transform_indices = @transform_3, window_bounds = array<i64: 32, 128>}, {pipeline_mode = #tpu.pipeline_mode<synchronous>, transform_indices = @transform_4, window_bounds = array<i64: 1, 128>}, {pipeline_mode = #tpu.pipeline_mode<synchronous>, transform_indices = @transform_5, window_bounds = array<i64: 4, 128>}, {pipeline_mode = #tpu.pipeline_mode<synchronous>, transform_indices = @transform_6, window_bounds = array<i64: 128, 128>}, {pipeline_mode = #tpu.pipeline_mode<synchronous>, transform_indices = @transform_7, window_bounds = array<i64: 1, 128>}, {pipeline_mode = #tpu.pipeline_mode<synchronous>, transform_indices = @transform_8, window_bounds = array<i64: 4, 128>}, {transform_indices = @transform_9, window_bounds = array<i64: 8, 128>}]} {
    %c0 = arith.constant 0 : index
    %c0_0 = arith.constant 0 : index
    %0 = vector.load %arg1[%c0, %c0_0] : memref<64x32xbf16, #tpu.memory_space<vmem>>, vector<64x32xbf16>
    %c0_1 = arith.constant 0 : index
    %c0_2 = arith.constant 0 : index
    %1 = vector.load %arg4[%c0_1, %c0_2] : memref<32x128xbf16, #tpu.memory_space<vmem>>, vector<32x128xbf16>
    %cst = arith.constant dense<0.000000e+00> : vector<64x128xf32>
    %2 = tpu.matmul %0, %1, %cst {dimension_numbers = #tpu.dot_dimension_numbers<[1], [0], [0], [1], [0, 0, 1, 1], [], []>} : vector<64x32xbf16>, vector<32x128xbf16>, vector<64x128xf32> -> vector<64x128xf32>
    %c0_3 = arith.constant 0 : index
    %c0_4 = arith.constant 0 : index
    %3 = vector.load %arg5[%c0_3, %c0_4] : memref<1x128xf32, #tpu.memory_space<vmem>>, vector<1x128xf32>
    %4 = vector.broadcast %3 : vector<1x128xf32> to vector<64x128xf32>
    %5 = arith.addf %2, %4 : vector<64x128xf32>
    %c0_5 = arith.constant 0 : index
    %c0_6 = arith.constant 0 : index
    %6 = vector.load %arg2[%c0_5, %c0_6] : memref<64x4xbf16, #tpu.memory_space<vmem>>, vector<64x4xbf16>
    %c0_7 = arith.constant 0 : index
    %c0_8 = arith.constant 0 : index
    %7 = vector.load %arg6[%c0_7, %c0_8] : memref<4x128xbf16, #tpu.memory_space<vmem>>, vector<4x128xbf16>
    %cst_9 = arith.constant dense<0.000000e+00> : vector<64x128xf32>
    %8 = tpu.matmul %6, %7, %cst_9 {dimension_numbers = #tpu.dot_dimension_numbers<[1], [0], [0], [1], [0, 0, 1, 1], [], []>} : vector<64x4xbf16>, vector<4x128xbf16>, vector<64x128xf32> -> vector<64x128xf32>
    %9 = arith.mulf %5, %8 : vector<64x128xf32>
    %10 = vector.shape_cast %9 : vector<64x128xf32> to vector<8x8x128xf32>
    %cst_10 = arith.constant dense<0xFF800000> : vector<8x128xf32>
    %11 = vector.multi_reduction <maximumf>, %10, %cst_10 [1] : vector<8x8x128xf32> to vector<8x128xf32>
    %c0_11 = arith.constant 0 : index
    %c0_12 = arith.constant 0 : index
    %12 = vector.load %arg7[%c0_11, %c0_12] : memref<128x128xf32, #tpu.memory_space<vmem>>, vector<128x128xf32>
    %cst_13 = arith.constant dense<0.000000e+00> : vector<8x128xf32>
    %13 = tpu.matmul %11, %12, %cst_13 {dimension_numbers = #tpu.dot_dimension_numbers<[1], [0], [0], [1], [0, 0, 1, 1], [], []>} : vector<8x128xf32>, vector<128x128xf32>, vector<8x128xf32> -> vector<8x128xf32>
    %c0_14 = arith.constant 0 : index
    %c0_15 = arith.constant 0 : index
    %14 = vector.load %arg8[%c0_14, %c0_15] : memref<1x128xf32, #tpu.memory_space<vmem>>, vector<1x128xf32>
    %15 = vector.broadcast %14 : vector<1x128xf32> to vector<8x128xf32>
    %16 = arith.addf %13, %15 : vector<8x128xf32>
    %c0_16 = arith.constant 0 : index
    %c0_17 = arith.constant 0 : index
    %17 = vector.load %arg3[%c0_16, %c0_17] : memref<8x4xbf16, #tpu.memory_space<vmem>>, vector<8x4xbf16>
    %c0_18 = arith.constant 0 : index
    %c0_19 = arith.constant 0 : index
    %18 = vector.load %arg9[%c0_18, %c0_19] : memref<4x128xbf16, #tpu.memory_space<vmem>>, vector<4x128xbf16>
    %cst_20 = arith.constant dense<0.000000e+00> : vector<8x128xf32>
    %19 = tpu.matmul %17, %18, %cst_20 {dimension_numbers = #tpu.dot_dimension_numbers<[1], [0], [0], [1], [0, 0, 1, 1], [], []>} : vector<8x4xbf16>, vector<4x128xbf16>, vector<8x128xf32> -> vector<8x128xf32>
    %20 = arith.mulf %16, %19 : vector<8x128xf32>
    %c0_21 = arith.constant 0 : index
    %c0_22 = arith.constant 0 : index
    %21 = vector.load %arg10[%c0_21, %c0_22] : memref<8x128xf32, #tpu.memory_space<vmem>>, vector<8x128xf32>
    tpu.vector_store %arg10[%c0_21, %c0_22], %20 {strides = array<i32>} : memref<8x128xf32, #tpu.memory_space<vmem>>, vector<8x128xf32>,
    return
  }
  func.func @transform_0(%arg0: i32) -> (i32, i32) {
    %c0_i32 = arith.constant 0 : i32
    %c0_i32_0 = arith.constant 0 : i32
    return %arg0, %c0_i32 : i32, i32
  }
  func.func @transform_1(%arg0: i32) -> (i32, i32) {
    %c0_i32 = arith.constant 0 : i32
    %c0_i32_0 = arith.constant 0 : i32
    return %arg0, %c0_i32 : i32, i32
  }
  func.func @transform_2(%arg0: i32) -> (i32, i32) {
    %c0_i32 = arith.constant 0 : i32
    %c0_i32_0 = arith.constant 0 : i32
    return %arg0, %c0_i32 : i32, i32
  }
  func.func @transform_3(%arg0: i32) -> (i32, i32) {
    %c0_i32 = arith.constant 0 : i32
    %c0_i32_0 = arith.constant 0 : i32
    %c0_i32_1 = arith.constant 0 : i32
    return %c0_i32, %c0_i32_0 : i32, i32
  }
  func.func @transform_4(%arg0: i32) -> (i32, i32) {
    %c0_i32 = arith.constant 0 : i32
    %c0_i32_0 = arith.constant 0 : i32
    %c0_i32_1 = arith.constant 0 : i32
    return %c0_i32, %c0_i32_0 : i32, i32
  }
  func.func @transform_5(%arg0: i32) -> (i32, i32) {
    %c0_i32 = arith.constant 0 : i32
    %c0_i32_0 = arith.constant 0 : i32
    %c0_i32_1 = arith.constant 0 : i32
    return %c0_i32, %c0_i32_0 : i32, i32
  }
  func.func @transform_6(%arg0: i32) -> (i32, i32) {
    %c0_i32 = arith.constant 0 : i32
    %c0_i32_0 = arith.constant 0 : i32
    %c0_i32_1 = arith.constant 0 : i32
    return %c0_i32, %c0_i32_0 : i32, i32
  }
  func.func @transform_7(%arg0: i32) -> (i32, i32) {
    %c0_i32 = arith.constant 0 : i32
    %c0_i32_0 = arith.constant 0 : i32
    %c0_i32_1 = arith.constant 0 : i32
    return %c0_i32, %c0_i32_0 : i32, i32
  }
  func.func @transform_8(%arg0: i32) -> (i32, i32) {
    %c0_i32 = arith.constant 0 : i32
    %c0_i32_0 = arith.constant 0 : i32
    %c0_i32_1 = arith.constant 0 : i32
    return %c0_i32, %c0_i32_0 : i32, i32
  }
  func.func @transform_9(%arg0: i32) -> (i32, i32) {
    %c0_i32 = arith.constant 0 : i32
    %c0_i32_0 = arith.constant 0 : i32
    return %arg0, %c0_i32 : i32, i32
  }
}

</mosaic_0001>

<bundles_post_ra>
// kernel: tpu_custom_call.1
= control target key start
LH: loop header
LB: loop body
LE: loop exit
PB: predicated region body
PF: predicated region fallthrough
CT: control target
= control target key end

     0   :  { %14 = vsyncpa [#allocation3], 0  ;;  %s612_s0 = inlined_call_operand.vmem [shape: bf16[64,32], index: 0, kind: input, shape index: {}]   ;;  %s613_s1 = inlined_call_operand.vmem [shape: bf16[64,4], index: 1, kind: input, shape index: {}]   ;;  %s614_s2 = inlined_call_operand.vmem [shape: bf16[8,4], index: 2, kind: input, shape index: {}]   ;;  %s615_s3 = inlined_call_operand.vmem [shape: bf16[32,128], index: 3, kind: input, shape index: {}]   ;;  %s616_s4 = inlined_call_operand.vmem [shape: f32[1,128], index: 4, kind: input, shape index: {}]   ;;  %s617_s5 = inlined_call_operand.vmem [shape: bf16[4,128], index: 5, kind: input, shape index: {}]   ;;  %s618_s6 = inlined_call_operand.hbm [shape: f32[128,128], index: 6, kind: input, shape index: {}]   ;;  %s619_s7 = inlined_call_operand.vmem [shape: f32[1,128], index: 7, kind: input, shape index: {}]   ;;  %s620_s8 = inlined_call_operand.vmem [shape: bf16[4,128], index: 8, kind: input, shape index: {}]   ;;  %s621_s9 = inlined_call_operand.hbm [shape: f32[8,128], index: 9, kind: output, shape index: {}]  }
   0x1   :  { %15 = vsyncpa [#allocation4], 0  ;;  %s32_s11 = sshll.u32 %s618_s6, 4  ;;  %s494_s12 = smov [#allocation2]   ;;  %s33_s11 = int_to_ptr.hbm [resolvable:$true] %s32_s11 }
   0x2   :  { %s34_s13 = sshll.u32 %s494_s12, 4  ;;  %s495_s14 = smov 128   ;;  %s35_s13 = int_to_ptr.vmem [resolvable:$true] %s34_s13 }
   0x3   :  { %s496_s15 = smov 8  }
   0x4   :  { %40 = dma.hbm_to_vmem [thread:$0]  %s33_s11, 2048, %s35_s13, [#allocation3], %s495_s14, %s495_s14, %s496_s15  }
   0x5   :  { %490 = dma.done.wait [#allocation3], 2048  }
   0x6   :  { %491 = vsyncadd [#allocation3], 4294965248  ;;  %vm182_vm0 = vcmask 1041408   ;;  %v428_v0 = vld [vmem:[%s615_s3 + $0x8] sm:$0xff]  ;;  %v148_v1 = vld [vmem:[%s617_s5] sm:$0x3] }
   0x7   :  { %v184_v2 = vsel %vm182_vm0, %v148_v1, 0  ;;  %v431_v3 = vld [vmem:[%s613_s1 + $0x10] sm:$0xff]  ;;  %117 = vmatpush.bf16.msra.mxu0 %v428_v0  ;;  %v427_v4 = vld [vmem:[%s615_s3] sm:$0xff]  ;;  %vm169_vm1 = vcmask 31744   ;;  %433 = vmatpush.bf16.msra.mxu3 %v428_v0  ;;  %vm98_vm2 = vcmask 261120   ;;  %v426_v7 = vld [vmem:[%s612_s0 + $0x18] sm:$0xff] }
   0x8   :  { %435 = vmatpush.bf16.msra.mxu2 %v184_v2  ;;  %v429_v5 = vld [vmem:[%s613_s1] sm:$0xff]  ;;  %193 = vmatpush.bf16.msra.mxu1 %v184_v2  ;;  %v432_v8 = vld [vmem:[%s613_s1 + $0x18] sm:$0xff]  ;;  %v430_v9 = vld [vmem:[%s613_s1 + $0x8] sm:$0xff]  ;;  %vm299_vm3 = vcmask 1041409   ;;  %vm301_vm4 = vcmask 1042434   ;;  %vm303_vm5 = vcmask 1043459  }
   0x9   :  { %v423_v6 = vld [vmem:[%s612_s0] sm:$0xff]  ;;  %v424_v10 = vld [vmem:[%s612_s0 + $0x8] sm:$0xff]  ;;  %v425_v11 = vld [vmem:[%s612_s0 + $0x10] sm:$0xff]  ;;  %vm305_vm6 = vcmask 1044484   ;;  %vm307_vm7 = vcmask 1045509   ;;  %vm309_vm8 = vcmask 1046534  }
   0xa   :  { %v286_v12 = vld [vmem:[#allocation2 + $0x78] sm:$0xff]  ;;  %v285_v14 = vld [vmem:[#allocation2 + $0x70] sm:$0xff]  ;;  %v284_v16 = vld [vmem:[#allocation2 + $0x68] sm:$0xff]  ;;  %vm311_vm9 = vcmask 1047559   ;;  %s497_s17 = smov [#allocation5]   ;;  %s364_s20 = sshll.u32 %s621_s9, 4  ;;  %s365_s20 = int_to_ptr.hbm [resolvable:$true] %s364_s20 }
   0xb   :  { %420 = vmatmul.msk.bf16.vlgmr.msra.gmra.mxu2 %vm169_vm1, %v431_v3  ;;  %118 = vmatpush.bf16.msra.mxu0 %v427_v4  ;;  %v283_v18 = vld [vmem:[#allocation2 + $0x60] sm:$0xff]  ;;  %v282_v19 = vld [vmem:[#allocation2 + $0x58] sm:$0xff]  ;;  %v281_v21 = vld [vmem:[#allocation2 + $0x50] sm:$0xff]  ;;  %s362_s18 = sshll.u32 %s497_s17, 4  ;;  %s363_s18 = int_to_ptr.vmem [resolvable:$true] %s362_s18 }
   0xc   :  { %418 = vmatmul.msk.bf16.vlgmr.msra.gmra.mxu1 %vm169_vm1, %v429_v5  ;;  %434 = vmatpush.bf16.msra.mxu3 %v427_v4  ;;  %v280_v23 = vld [vmem:[#allocation2 + $0x48] sm:$0xff]  ;;  %v279_v25 = vld [vmem:[#allocation2 + $0x40] sm:$0xff]  ;;  %v278_v26 = vld [vmem:[#allocation2 + $0x38] sm:$0xff] }
   0xd   :  { %314 = vmatpush.msrb.mxu2 %v286_v12  ;;  %v335_v27 = vld [vmem:[%s620_s8] sm:$0x3]  ;;  %v277_v30 = vld [vmem:[#allocation2 + $0x30] sm:$0xff]  ;;  %v276_v33 = vld [vmem:[#allocation2 + $0x28] sm:$0xff] }
   0xe   :  { %398 = vmatmul.msk.bf16.vlgmr.msra.gmra.mxu0 %vm98_vm2, %v423_v6  ;;  %v340_v29 = vsel %vm182_vm0, %v335_v27, 0  ;;  %v334_v34 = vld [vmem:[%s614_s2] sm:$0xf]  ;;  %v274_v38 = vld [vmem:[#allocation2 + $0x18] sm:$0xff]  ;;  %v273_v41 = vld [vmem:[#allocation2 + $0x10] sm:$0xff] }
   0xf   :  { %401 = vmatmul.msk.bf16.vlgmr.msra.gmra.mxu3 %vm98_vm2, %v426_v7  ;;  %315 = vmatpush.msrb.mxu2 %v285_v14  ;;  %v275_v35 = vld [vmem:[#allocation2 + $0x20] sm:$0xff]  ;;  %v272_v43 = vld [vmem:[#allocation2 + $0x8] sm:$0xff] }
  0x10   :  { %349 = vmatpush.bf16.msrb.mxu3 %v340_v29  ;;  %v440_v36 = vld [vmem:[%s616_s4] ss:$0 sm:$0xff] }
  0x11   :  { %316 = vmatpush.msrb.mxu2 %v284_v16  ;;  %v271_v46 = vld [vmem:[#allocation2] sm:$0xff] }
  0x13   :  { %317 = vmatpush.msrb.mxu2 %v283_v18 }
  0x15   :  { %318 = vmatpush.msrb.mxu2 %v282_v19 }
  0x17   :  { %319 = vmatpush.msrb.mxu2 %v281_v21 }
  0x19   :  { %320 = vmatpush.msrb.mxu2 %v280_v23 }
  0x1b   :  { %421 = vmatmul.msk.bf16.gmra.mxu2 %vm169_vm1, %v432_v8 }
  0x1c   :  { %419 = vmatmul.msk.bf16.gmra.mxu1 %vm169_vm1, %v430_v9  ;;  %321 = vmatpush.msrb.mxu2 %v279_v25 }
  0x1e   :  { %399 = vmatmul.msk.bf16.gmra.mxu0 %vm98_vm2, %v424_v10  ;;  %322 = vmatpush.msrb.mxu2 %v278_v26 }
  0x1f   :  { %422 = vmatmul.msk.bf16.vlgmr.msrb.gmra.mxu3 %vm169_vm1, %v334_v34 }
  0x20   :  { %323 = vmatpush.msrb.mxu2 %v277_v30 }
  0x22   :  { %324 = vmatpush.msrb.mxu2 %v276_v33 }
  0x24   :  { %325 = vmatpush.msrb.mxu2 %v275_v35 }
  0x26   :  { %326 = vmatpush.msrb.mxu2 %v274_v38 }
  0x28   :  { %327 = vmatpush.msrb.mxu2 %v273_v41 }
  0x2a   :  { %328 = vmatpush.msrb.mxu2 %v272_v43 }
  0x2c   :  { %329 = vmatpush.msrb.mxu2 %v271_v46 }
  0x2e   :  { %400 = vmatmul.msk.bf16.gmra.mxu0 %vm98_vm2, %v425_v11 }
  0x89   :  { %v195_v13 = vpop.f32.mrf.mxu1 }
  0x8b   :  { %v120_v15 = vpop.f32.mrf.mxu0 }
  0x8c   :  { %v121_v42 = vadd.f32 %v440_v36, %v120_v15 }
  0x8e   :  { %v589_v17 = vpop.f32.mrf.mxu2  ;;  %v215_v51 = vmul.f32 %v195_v13, %v121_v42 }
  0x90   :  { %v223_v58 = vrot.slane %v215_v51, 4 }
  0x91   :  { %v197_v20 = vpop.f32.mrf.mxu1 }
  0x92   :  { %v135_v32 = vpop.f32.mrf.mxu3  ;;  %v224_v2 = vmax.f32 %v215_v51, %v223_v58 }
  0x93   :  { %v122_v22 = vpop.f32.mrf.mxu0  ;;  %v136_v53 = vadd.f32 %v440_v36, %v135_v32 }
  0x94   :  { %v123_v39 = vadd.f32 %v440_v36, %v122_v22  ;;  %v225_v10 = vrot.slane %v224_v2, 2 }
  0x96   :  { %v591_v24 = vpop.f32.mrf.mxu2  ;;  %v216_v47 = vmul.f32 %v197_v20, %v123_v39  ;;  %v226_v21 = vmax.f32 %v224_v2, %v225_v10 }
  0x98   :  { %v229_v54 = vrot.slane %v216_v47, 4  ;;  %v227_v30 = vrot.slane %v226_v21, 1 }
  0x99   :  { %v200_v28 = vpop.f32.mrf.mxu1 }
  0x9a   :  { %v137_v50 = vpop.f32.mrf.mxu3  ;;  %v230_v62 = vmax.f32 %v216_v47, %v229_v54  ;;  %v228_v39 = vmax.f32 %v226_v21, %v227_v30 }
  0x9b   :  { %v125_v31 = vpop.f32.mrf.mxu0  ;;  %v138_v55 = vadd.f32 %v440_v36, %v137_v50 }
  0x9c   :  { %v126_v40 = vadd.f32 %v440_v36, %v125_v31  ;;  %v231_v6 = vrot.slane %v230_v62, 2 }
  0x9e   :  { %v210_v37 = vpop.f32.mrf.mxu2  ;;  %v217_v49 = vmul.f32 %v200_v28, %v126_v40  ;;  %v232_v15 = vmax.f32 %v230_v62, %v231_v6 }
  0x9f   :  { %v221_v60 = vmul.f32 %v210_v37, %v136_v53 }
  0xa0   :  { %v235_v56 = vrot.slane %v217_v49, 4  ;;  %v233_v26 = vrot.slane %v232_v15, 1 }
  0xa1   :  { %v202_v45 = vpop.f32.mrf.mxu1  ;;  %v259_v5 = vrot.slane %v221_v60, 4 }
  0xa2   :  { %v236_v1 = vmax.f32 %v217_v49, %v235_v56  ;;  %v234_v35 = vmax.f32 %v232_v15, %v233_v26 }
  0xa3   :  { %v127_v44 = vpop.f32.mrf.mxu0  ;;  %v260_v13 = vmax.f32 %v221_v60, %v259_v5 }
  0xa4   :  { %v128_v48 = vadd.f32 %v440_v36, %v127_v44  ;;  %v237_v9 = vrot.slane %v236_v1, 2  ;;  %v300_v43 = vsel %vm299_vm3, %v234_v35, %v228_v39 }
  0xa6   :  { %v218_v52 = vmul.f32 %v202_v45, %v128_v48  ;;  %v212_v57 = vpop.f32.mrf.mxu2  ;;  %v238_v20 = vmax.f32 %v236_v1, %v237_v9 }
  0xa7   :  { %v222_v63 = vmul.f32 %v212_v57, %v138_v55  ;;  %v351_v55 = vpop.f32.mrf.mxu3  ;;  %v441_v57 = vld [vmem:[%s619_s7] ss:$0 sm:$0xff] }
  0xa8   :  { %v241_v59 = vrot.slane %v218_v52, 4  ;;  %v239_v29 = vrot.slane %v238_v20, 1 }
  0xa9   :  { %v265_v7 = vrot.slane %v222_v63, 4 }
  0xaa   :  { %v242_v3 = vmax.f32 %v218_v52, %v241_v59 }
  0xab   :  { %v130_v61 = vpop.f32.mrf.mxu0  ;;  %v266_v16 = vmax.f32 %v222_v63, %v265_v7 }
  0xac   :  { %v131_v0 = vadd.f32 %v440_v36, %v130_v61  ;;  %v243_v11 = vrot.slane %v242_v3, 2 }
  0xad   :  { %v267_v27 = vrot.slane %v266_v16, 2 }
  0xae   :  { %v219_v4 = vmul.f32 %v589_v17, %v131_v0  ;;  %v244_v22 = vmax.f32 %v242_v3, %v243_v11  ;;  %v261_v17 = vrot.slane %v260_v13, 2 }
  0xaf   :  { %v268_v37 = vmax.f32 %v266_v16, %v267_v27  ;;  %v353_v56 = vpop.f32.mrf.mxu3 }
  0xb0   :  { %v247_v8 = vrot.slane %v219_v4, 4  ;;  %v245_v31 = vrot.slane %v244_v22, 1  ;;  %v262_v33 = vmax.f32 %v260_v13, %v261_v17 }
  0xb1   :  { %v269_v44 = vrot.slane %v268_v37, 1 }
  0xb2   :  { %v248_v12 = vmax.f32 %v219_v4, %v247_v8  ;;  %v246_v40 = vmax.f32 %v244_v22, %v245_v31  ;;  %v263_v41 = vrot.slane %v262_v33, 1 }
  0xb3   :  { %v132_v14 = vpop.f32.mrf.mxu0  ;;  %v270_v51 = vmax.f32 %v268_v37, %v269_v44 }
  0xb4   :  { %v249_v18 = vrot.slane %v248_v12, 2  ;;  %v133_v19 = vadd.f32 %v440_v36, %v132_v14  ;;  %v240_v36 = vmax.f32 %v238_v20, %v239_v29  ;;  %v264_v49 = vmax.f32 %v262_v33, %v263_v41 }
  0xb6   :  { %v220_v23 = vmul.f32 %v591_v24, %v133_v19  ;;  %v250_v25 = vmax.f32 %v248_v12, %v249_v18  ;;  %v302_v46 = vsel %vm301_vm4, %v240_v36, %v300_v43 }
  0xb7   :  { %v304_v48 = vsel %vm303_vm5, %v246_v40, %v302_v46 }
  0xb8   :  { %v253_v28 = vrot.slane %v220_v23, 4  ;;  %v251_v34 = vrot.slane %v250_v25, 1 }
  0xba   :  { %v254_v32 = vmax.f32 %v220_v23, %v253_v28  ;;  %v252_v42 = vmax.f32 %v250_v25, %v251_v34 }
  0xbc   :  { %v255_v38 = vrot.slane %v254_v32, 2  ;;  %v306_v50 = vsel %vm305_vm6, %v252_v42, %v304_v48 }
  0xbe   :  { %v256_v24 = vmax.f32 %v254_v32, %v255_v38 }
  0xc0   :  { %v257_v45 = vrot.slane %v256_v24, 1 }
  0xc2   :  { %v258_v47 = vmax.f32 %v256_v24, %v257_v45 }
  0xc4   :  { %v308_v52 = vsel %vm307_vm7, %v258_v47, %v306_v50 }
  0xc5   :  { %v310_v53 = vsel %vm309_vm8, %v264_v49, %v308_v52 }
  0xc6   :  { %v312_v54 = vsel %vm311_vm9, %v270_v51, %v310_v53 }
  0xc7   :  { %330 = vmatmul.f32.vlgmr.msrb.gmra.mxu2 %v312_v54 }
 0x14a   :  { %v331_v58 = vpop.f32.mrf.mxu2 }
 0x14b   :  { %v332_v59 = vadd.f32 %v441_v57, %v331_v58 }
 0x14d   :  { %v355_v60 = vmul.f32 %v351_v55, %v332_v59 }
 0x14f   :  { %356 = vst [vmem:[#allocation5] sm:$0xff] %v355_v60 }
 0x150   :  { %367 = dma.vmem_to_hbm [thread:$0]  %s363_s18, 128, %s365_s20, [#allocation4]  }
 0x151   :  { %492 = dma.done.wait [#allocation4], 128  }
 0x152   :  { %493 = vsyncadd [#allocation4], 4294967168 }
 0x153   :  { %372 = vsyncpa [#allocation3], 1 }
 0x154   :  { %373 = vsyncpa [#allocation4], 1 }

</bundles_post_ra>
